<compile_context>
chip_gen: v6e
topology: v6e:2x2x1
jax: 0.10.0
libtpu: 0.0.40
codegen_flags: <defaults>
</compile_context>

<pallas_src>
import math

import jax
import jax.numpy as jnp
from jax import lax
from jax.experimental import pallas as pl
from jax.experimental.pallas import tpu as pltpu

IN_FEATURES = 100
OUT_FEATURES = 100

# Max rows per batch tile.  At 100 f32 lanes: x tile ~1.6 MiB + out tile
# ~1.6 MiB, double-buffered ~6.5 MiB -- inside the default scoped VMEM on
# v5e (16 MiB), v6e (32 MiB) and v7x (32 MiB scoped of 64 MiB physical).
TB_MAX = 4096


def _linear_kernel(x_ref, w_ref, o_ref):
    # x_ref: (TB, 100) f32   w_ref: (100, 100) f32 in PyTorch (OUT, IN) layout
    # out = x @ w.T  ==  contract IN axis of x with IN axis of w (trans_b
    # matmul on the MXU, f32 accumulation).  Cast is a no-op for f32 output.
    o_ref[...] = lax.dot_general(
        x_ref[...],
        w_ref[...],
        dimension_numbers=(((1,), (1,)), ((), ())),
        preferred_element_type=jnp.float32,
    ).astype(o_ref.dtype)


def noisenet_forward(x, w):
    """Forward pass of NoiseNet: out = x @ w.T.

    x: (B, 100) float32
    w: (100, 100) float32, PyTorch layout (OUT, IN)
    returns: (B, 100) float32
    """
    B = x.shape[0]

    # Small/medium batch: one block equal to the full array (always a legal
    # block shape).  Large batch: TB_MAX-row tiles (multiple of 8 sublanes),
    # pipelined across the grid and megacore-parallel on v7x.  A ragged last
    # block is masked by Pallas on the output store; any garbage rows read in
    # a ragged *input* block only feed those masked output rows, so the valid
    # result is unaffected (the K=100 contraction always sees real data).
    TB = B if B <= TB_MAX else TB_MAX
    grid = (pl.cdiv(B, TB),)

    cost = pl.CostEstimate(
        flops=2 * B * IN_FEATURES * OUT_FEATURES,
        transcendentals=0,
        bytes_accessed=(x.size * 4 + w.size * 4 + B * OUT_FEATURES * 4),
    )

    return pl.pallas_call(
        _linear_kernel,
        out_shape=jax.ShapeDtypeStruct((B, OUT_FEATURES), jnp.float32),
        grid_spec=pl.GridSpec(
            grid=grid,
            in_specs=[
                # x streams tile-by-tile from its original unpadded f32 layout.
                pl.BlockSpec((TB, IN_FEATURES), lambda i: (i, 0)),
                # Weight: constant index_map -> fetched once, stays resident.
                pl.BlockSpec((OUT_FEATURES, IN_FEATURES), lambda i: (0, 0)),
            ],
            # Output written directly at its final shape (no post-kernel slice).
            out_specs=pl.BlockSpec((TB, OUT_FEATURES), lambda i: (i, 0)),
        ),
        compiler_params=pltpu.CompilerParams(
            dimension_semantics=("parallel",),
        ),
        cost_estimate=cost,
    )(x, w)


def init_params(key):
    # Deterministic init mimicking PyTorch's default kaiming-uniform for
    # nn.Linear: U(-1/sqrt(fan_in), 1/sqrt(fan_in)). W has shape (OUT, IN).
    bound = 1.0 / math.sqrt(IN_FEATURES)
    w = jax.random.uniform(
        key, (OUT_FEATURES, IN_FEATURES), jnp.float32, minval=-bound, maxval=bound
    )
    return w


if __name__ == "__main__":
    key = jax.random.PRNGKey(0)
    k_w, k_x = jax.random.split(key)

    w = init_params(k_w)  # (OUT, IN) like PyTorch

    B = 2
    x = jax.random.normal(k_x, (B, IN_FEATURES), jnp.float32)

    out = jax.block_until_ready(noisenet_forward(x, w))

    # Reference (same semantics as PyTorch: out = x @ W.T), full f32.
    ref = x @ w.T

    assert out.shape == (B, OUT_FEATURES)
    assert jnp.allclose(out, ref, atol=1e-2, rtol=1e-2), float(
        jnp.max(jnp.abs(out - ref))
    )

    print("KERNEL_OK")
</pallas_src>

<mosaic_0001>
module attributes {stable_mosaic.version = 11 : i64} {
  func.func @_linear_kernel(%arg0: i32, %arg1: memref<2x100xf32, #tpu.memory_space<vmem>>, %arg2: memref<100x100xf32, #tpu.memory_space<vmem>>, %arg3: memref<2x100xf32, #tpu.memory_space<vmem>>) attributes {dimension_semantics = [#tpu.dimension_semantics<parallel>], iteration_bounds = array<i64: 1>, scalar_prefetch = 0 : i64, scratch_operands = 0 : i64, tpu.core_type = #tpu.core_type<tc>, window_params = [{transform_indices = @transform_0, window_bounds = array<i64: 2, 100>}, {pipeline_mode = #tpu.pipeline_mode<synchronous>, transform_indices = @transform_1, window_bounds = array<i64: 100, 100>}, {transform_indices = @transform_2, window_bounds = array<i64: 2, 100>}]} {
    %c0 = arith.constant 0 : index
    %c0_0 = arith.constant 0 : index
    %0 = vector.load %arg1[%c0, %c0_0] : memref<2x100xf32, #tpu.memory_space<vmem>>, vector<2x100xf32>
    %c0_1 = arith.constant 0 : index
    %c0_2 = arith.constant 0 : index
    %1 = vector.load %arg2[%c0_1, %c0_2] : memref<100x100xf32, #tpu.memory_space<vmem>>, vector<100x100xf32>
    %cst = arith.constant dense<0.000000e+00> : vector<2x100xf32>
    %2 = tpu.matmul %0, %1, %cst {dimension_numbers = #tpu.dot_dimension_numbers<[1], [1], [0], [0], [0, 0, 1, 0], [], []>} : vector<2x100xf32>, vector<100x100xf32>, vector<2x100xf32> -> vector<2x100xf32>
    %c0_3 = arith.constant 0 : index
    %c0_4 = arith.constant 0 : index
    %3 = vector.load %arg3[%c0_3, %c0_4] : memref<2x100xf32, #tpu.memory_space<vmem>>, vector<2x100xf32>
    tpu.vector_store %arg3[%c0_3, %c0_4], %2 {strides = array<i32>} : memref<2x100xf32, #tpu.memory_space<vmem>>, vector<2x100xf32>,
    return
  }
  func.func @transform_0(%arg0: i32) -> (i32, i32) {
    %c0_i32 = arith.constant 0 : i32
    %c0_i32_0 = arith.constant 0 : i32
    return %arg0, %c0_i32 : i32, i32
  }
  func.func @transform_1(%arg0: i32) -> (i32, i32) {
    %c0_i32 = arith.constant 0 : i32
    %c0_i32_0 = arith.constant 0 : i32
    %c0_i32_1 = arith.constant 0 : i32
    return %c0_i32, %c0_i32_0 : i32, i32
  }
  func.func @transform_2(%arg0: i32) -> (i32, i32) {
    %c0_i32 = arith.constant 0 : i32
    %c0_i32_0 = arith.constant 0 : i32
    return %arg0, %c0_i32 : i32, i32
  }
}

</mosaic_0001>

<bundles_post_ra>
// kernel: tpu_custom_call.1
= control target key start
LH: loop header
LB: loop body
LE: loop exit
PB: predicated region body
PF: predicated region fallthrough
CT: control target
= control target key end

     0   :  { %7 = vsyncpa [#allocation3], 0  ;;  %s358_s0 = inlined_call_operand.hbm [shape: f32[2,100], index: 0, kind: input, shape index: {}]   ;;  %s359_s1 = inlined_call_operand.hbm [shape: f32[100,100], index: 1, kind: input, shape index: {}]   ;;  %s360_s2 = inlined_call_operand.hbm [shape: f32[2,100], index: 2, kind: output, shape index: {}]  }
   0x1   :  { %8 = vsyncpa [#allocation6], 0 }
   0x2   :  { %9 = vsyncpa [#allocation4], 0  ;;  %s313_s9 = smov [#allocation2]   ;;  %s314_s11 = smov [#allocation5]  }
   0x3   :  { %s16_s10 = sshll.u32 %s313_s9, 4  ;;  %s25_s12 = sshll.u32 %s314_s11, 4  ;;  %s17_s10 = int_to_ptr.vmem [resolvable:$true] %s16_s10  ;;  %s26_s12 = int_to_ptr.vmem [resolvable:$true] %s25_s12 }
   0x4   :  { %s255_s13 = scalar_lea.vmem %s17_s10, 32  ;;  %p260_p1 = scmp.lt.s32.totalorder %s17_s10, %s17_s10 }
   0x5   :  { %p256_p0 = scmp.ne.s32.totalorder %s17_s10, %s255_s13  ;;  %p261_p2 = scmp.lt.s32.totalorder %s255_s13, %s255_s13 }
   0x7   :  { %p262_p3 = por %p261_p2, %p260_p1 }
   0x9   :  { %p263_p4 = pnand %p262_p3, %p256_p0 }
   0xb   :  { %266 = shalt.err (!%p263_p4)
}
   0xc   :  { %19 = dma.hbm_to_vmem [thread:$0]  %s358_s0, 32, %s17_s10, [#allocation3]  }
   0xd   :  { %s275_s16 = scalar_lea.vmem %s26_s12, 1664  ;;  %p280_p6 = scmp.lt.s32.totalorder %s26_s12, %s26_s12 }
   0xe   :  { %p276_p5 = scmp.ne.s32.totalorder %s26_s12, %s275_s16  ;;  %p281_p7 = scmp.lt.s32.totalorder %s275_s16, %s275_s16 }
  0x10   :  { %p282_p8 = por %p281_p7, %p280_p6 }
  0x12   :  { %p283_p9 = pnand %p282_p8, %p276_p5 }
  0x14   :  { %286 = shalt.err (!%p283_p9)
}
  0x15   :  { %s315_s17 = smov 128   ;;  %s316_s18 = smov 8  }
  0x16   :  { %31 = dma.hbm_to_vmem [thread:$0]  %s359_s1, 1664, %s26_s12, [#allocation6], %s315_s17, %s315_s17, %s316_s18  }
  0x17   :  { %307 = dma.done.wait [#allocation3], 32  }
  0x18   :  { %308 = vsyncadd [#allocation3], 4294967264 }
  0x19   :  { %309 = dma.done.wait [#allocation6], 1664  }
  0x1a   :  { %310 = vsyncadd [#allocation6], 4294965632  ;;  %v317_v0 = vmov 0.0   ;;  %vm318_vm0 = vmmov 0   ;;  %vm52_vm1 = vcmask 818176   ;;  %v50_v2 = vld [vmem:[#allocation5 + $0x58] sm:$0xff] }
  0x1b   :  { %211 = vmatprep.subr.mxu0 %v317_v0  ;;  %237 = vmatprep.mubr.msk.f32.mxu0 %vm318_vm0, %v317_v0  ;;  %v51_v1 = vld [vmem:[#allocation5 + $0x60] sm:$0xf]  ;;  %v49_v3 = vld [vmem:[#allocation5 + $0x50] sm:$0xff]  ;;  %v48_v4 = vld [vmem:[#allocation5 + $0x48] sm:$0xff]  ;;  %s319_s0 = smov [#allocation7]   ;;  %vm165_vm2 = vcmask 812032  }
  0x1c   :  { %212 = vmatpush3.xpose.msk.msra.mxu0 %vm52_vm1, %v51_v1  ;;  %v47_v5 = vld [vmem:[#allocation5 + $0x40] sm:$0xff]  ;;  %v46_v6 = vld [vmem:[#allocation5 + $0x38] sm:$0xff]  ;;  %v45_v7 = vld [vmem:[#allocation5 + $0x30] sm:$0xff]  ;;  %s173_s1 = sshll.u32 %s319_s0, 4  ;;  %s174_s1 = int_to_ptr.vmem [resolvable:$true] %s173_s1 }
  0x1d   :  { %213 = vmatprep.subr.mxu0 %v317_v0  ;;  %v44_v8 = vld [vmem:[#allocation5 + $0x28] sm:$0xff]  ;;  %v43_v9 = vld [vmem:[#allocation5 + $0x20] sm:$0xff]  ;;  %v42_v10 = vld [vmem:[#allocation5 + $0x18] sm:$0xff]  ;;  %s287_s21 = scalar_lea.vmem %s174_s1, 32  ;;  %p292_p11 = scmp.lt.s32.totalorder %s174_s1, %s174_s1 }
  0x1e   :  { %v41_v11 = vld [vmem:[#allocation5 + $0x10] sm:$0xff]  ;;  %v40_v12 = vld [vmem:[#allocation5 + $0x8] sm:$0xff]  ;;  %v39_v13 = vld [vmem:[#allocation5] sm:$0xff]  ;;  %p288_p10 = scmp.ne.s32.totalorder %s174_s1, %s287_s21  ;;  %p293_p12 = scmp.lt.s32.totalorder %s287_s21, %s287_s21 }
  0x1f   :  { %v38_v14 = vld [vmem:[#allocation2] sm:$0x3] }
  0x20   :  { %214 = vmatpush3.xpose.msk.msra.mxu0 %vm52_vm1, %v50_v2  ;;  %p294_p13 = por %p293_p12, %p292_p11 }
  0x21   :  { %215 = vmatprep.subr.mxu0 %v317_v0 }
  0x22   :  { %p295_p0 = pnand %p294_p13, %p288_p10 }
  0x24   :  { %216 = vmatpush3.xpose.msk.msra.mxu0 %vm52_vm1, %v49_v3 }
  0x25   :  { %217 = vmatprep.subr.mxu0 %v317_v0 }
  0x28   :  { %218 = vmatpush3.xpose.msk.msra.mxu0 %vm52_vm1, %v48_v4 }
  0x29   :  { %219 = vmatprep.subr.mxu0 %v317_v0 }
  0x2c   :  { %220 = vmatpush3.xpose.msk.msra.mxu0 %vm52_vm1, %v47_v5 }
  0x2d   :  { %221 = vmatprep.subr.mxu0 %v317_v0 }
  0x30   :  { %222 = vmatpush3.xpose.msk.msra.mxu0 %vm52_vm1, %v46_v6 }
  0x31   :  { %223 = vmatprep.subr.mxu0 %v317_v0 }
  0x34   :  { %224 = vmatpush3.xpose.msk.msra.mxu0 %vm52_vm1, %v45_v7 }
  0x35   :  { %225 = vmatprep.subr.mxu0 %v317_v0 }
  0x38   :  { %226 = vmatpush3.xpose.msk.msra.mxu0 %vm52_vm1, %v44_v8 }
  0x39   :  { %227 = vmatprep.subr.mxu0 %v317_v0 }
  0x3c   :  { %228 = vmatpush3.xpose.msk.msra.mxu0 %vm52_vm1, %v43_v9 }
  0x3d   :  { %229 = vmatprep.subr.mxu0 %v317_v0 }
  0x40   :  { %230 = vmatpush3.xpose.msk.msra.mxu0 %vm52_vm1, %v42_v10 }
  0x41   :  { %231 = vmatprep.subr.mxu0 %v317_v0 }
  0x44   :  { %232 = vmatpush3.xpose.msk.msra.mxu0 %vm52_vm1, %v41_v11 }
  0x45   :  { %233 = vmatprep.subr.mxu0 %v317_v0 }
  0x48   :  { %234 = vmatpush3.xpose.msk.msra.mxu0 %vm52_vm1, %v40_v12 }
  0x49   :  { %235 = vmatprep.subr.mxu0 %v317_v0 }
  0x4c   :  { %236 = vmatpush3.xpose.msk.msra.mxu0 %vm52_vm1, %v39_v13 }
  0x4f   :  { %238 = vmatmul.mubr.msk.f32.vlgmr.msra.gmra.mxu0 %vm52_vm1, %v38_v14 }
 0x10f   :  { %v161_v15 = vpop.f32.mrf.mxu0 }
 0x110   :  { %166 = vst.msk [vmem:[#allocation7] sm:$0x3] %vm165_vm2, %v161_v15 }
 0x111   :  { %v239_v16 = vpop.f32.mrf.mxu0 }
 0x112   :  { %298 = shalt.err (!%p295_p0)
}
 0x113   :  { %176 = dma.vmem_to_hbm [thread:$0]  %s174_s1, 32, %s360_s2, [#allocation4]  }
 0x114   :  { %311 = dma.done.wait [#allocation4], 32  }
 0x115   :  { %312 = vsyncadd [#allocation4], 4294967264 }
 0x116   :  { %180 = vsyncpa [#allocation3], 1 }
 0x117   :  { %181 = vsyncpa [#allocation6], 1 }
 0x118   :  { %182 = vsyncpa [#allocation4], 1 }

</bundles_post_ra>
